<compile_context>
chip_gen: v7x
topology: tpu7x:2x2x1
jax: 0.10.0
libtpu: 0.0.40
codegen_flags: <defaults>
</compile_context>

<pallas_src>
import functools

import jax
import jax.numpy as jnp
from jax.experimental import pallas as pl
from jax.experimental.pallas import tpu as pltpu


def _round_up(x, m):
    return (x + m - 1) // m * m


def dense_fc_kernel(x_ref, w1_ref, b1_ref, w2_ref, b2_ref, out_ref, *,
                    bf16_tanh):
    # x arrives as raw f32 straight from HBM (no wrapper pad/cast); the bf16
    # cast for the MXU is a cheap VPU op hidden under the DMA.
    x = x_ref[...].astype(jnp.bfloat16)

    # h1 = tanh(x @ W1 + b1): bf16 MXU matmul, f32 accumulate + bias add.
    h1 = jnp.dot(x, w1_ref[...], preferred_element_type=jnp.float32)
    h1 = h1 + b1_ref[...]
    if bf16_tanh:
        # v6e/v7x: bf16 EUP packs 2x elements per push, and the result is
        # already in the MXU input dtype for dot2 (no separate cast).
        h1 = jnp.tanh(h1.astype(jnp.bfloat16))
    else:
        # v5e-safe path: f32 tanh, then cast for the MXU.
        h1 = jnp.tanh(h1).astype(jnp.bfloat16)

    # out = tanh(h1 @ W2 + b2): f32 accumulate, f32 epilogue, store out dtype.
    h2 = jnp.dot(h1, w2_ref[...], preferred_element_type=jnp.float32)
    out_ref[...] = jnp.tanh(h2 + b2_ref[...]).astype(out_ref.dtype)


def prepare_params(w1, b1, w2, b2):
    """Pad only the hidden dim to a multiple of 128; cast weights to bf16.

    in_dim and out_dim stay at their true sizes (BlockSpec dims equal to the
    full array dim are legal), so x needs no padding and the output needs no
    wrapper-side slice.  Zero-padding keeps the math exact: padded h1 lanes
    are tanh(0 + 0) = 0 and multiply zero W2 rows.
    """
    in_dim, h1 = w1.shape
    h2 = w2.shape[1]
    h1_p = _round_up(h1, 128)

    w1_p = jnp.zeros((in_dim, h1_p), jnp.bfloat16).at[:, :h1].set(
        w1.astype(jnp.bfloat16))
    b1_p = jnp.zeros((1, h1_p), jnp.float32).at[:, :h1].set(
        b1.astype(jnp.float32).reshape(1, h1))
    w2_p = jnp.zeros((h1_p, h2), jnp.bfloat16).at[:h1, :].set(
        w2.astype(jnp.bfloat16))
    b2_p = b2.astype(jnp.float32).reshape(1, h2)
    return w1_p, b1_p, w2_p, b2_p


def _pick_batch_tile(B, tile_b):
    """Rows per grid step: sublane-legal, >=2 steps when the batch allows it."""
    if B <= 16:
        return _round_up(B, 8)
    # Split into at least two blocks (keeps v7x's second TensorCore busy),
    # cap at tile_b, keep a multiple of 16 (bf16 packs 2 rows per sublane).
    tb = min(tile_b, _round_up((B + 1) // 2, 16))
    return max(16, _round_up(tb, 16))


@functools.partial(jax.jit,
                   static_argnames=("tile_b", "bf16_tanh", "out_dtype"))
def dense_fc(x, params, tile_b=512, bf16_tanh=False, out_dtype=None):
    """y = tanh(tanh(x @ W1 + b1) @ W2 + b2), x: (B, in_dim) f32."""
    w1, b1, w2, b2 = params
    B, in_dim = x.shape
    h1_p = w1.shape[1]
    out_dim = w2.shape[1]
    out_dtype = x.dtype if out_dtype is None else out_dtype

    tb = _pick_batch_tile(B, tile_b)
    grid = (pl.cdiv(B, tb),)   # non-divisible B: last block is masked

    kernel = functools.partial(dense_fc_kernel, bf16_tanh=bf16_tanh)
    return pl.pallas_call(
        kernel,
        out_shape=jax.ShapeDtypeStruct((B, out_dim), out_dtype),
        grid_spec=pl.GridSpec(
            grid=grid,
            in_specs=[
                # x: one unpadded row tile per grid step (streams from HBM).
                pl.BlockSpec((tb, in_dim), lambda i: (i, 0)),
                # Weights/biases: constant block index -> fetched once,
                # VMEM-resident across all batch tiles (~66 KB total).
                pl.BlockSpec((in_dim, h1_p), lambda i: (0, 0)),
                pl.BlockSpec((1, h1_p), lambda i: (0, 0)),
                pl.BlockSpec((h1_p, out_dim), lambda i: (0, 0)),
                pl.BlockSpec((1, out_dim), lambda i: (0, 0)),
            ],
            out_specs=pl.BlockSpec((tb, out_dim), lambda i: (i, 0)),
        ),
        compiler_params=pltpu.CompilerParams(
            dimension_semantics=("parallel",)),
    )(x, w1, b1, w2, b2)


def _default_bf16_tanh():
    """Enable the bf16 tanh epilogue only on chips with a bf16 EUP (v6e+)."""
    try:
        kind = jax.devices()[0].device_kind.lower()
    except Exception:
        return False
    return not any(tag in kind for tag in ("v2", "v3", "v4", "v5"))


def init_params(key, in_dim, model_select=(200, 100), dtype=jnp.float32):
    """Deterministic init mimicking nn.Linear's U(-1/sqrt(fan_in), ...)."""
    k1, k2, k3, k4 = jax.random.split(key, 4)
    h1, h2 = model_select
    lim1 = 1.0 / jnp.sqrt(in_dim)
    lim2 = 1.0 / jnp.sqrt(h1)
    w1 = jax.random.uniform(k1, (in_dim, h1), dtype, -lim1, lim1)
    b1 = jax.random.uniform(k2, (1, h1), dtype, -lim1, lim1)
    w2 = jax.random.uniform(k3, (h1, h2), dtype, -lim2, lim2)
    b2 = jax.random.uniform(k4, (1, h2), dtype, -lim2, lim2)
    return w1, b1, w2, b2


if __name__ == "__main__":
    key = jax.random.PRNGKey(0)
    kx, kp = jax.random.split(key)

    B, in_dim = 8, 32
    model_select = (200, 100)

    x = jax.random.normal(kx, (B, in_dim), jnp.float32)
    w1, b1, w2, b2 = init_params(kp, in_dim, model_select)
    params = prepare_params(w1, b1, w2, b2)

    out = dense_fc(x, params, bf16_tanh=_default_bf16_tanh())
    out = jax.block_until_ready(out)

    # Pure-JAX f32 reference. Tolerance widened because the kernel's matmul
    # inputs (x, W1, W2, hidden activation) are rounded to bf16.
    ref = jnp.tanh(jnp.tanh(x @ w1 + b1) @ w2 + b2)
    assert out.shape == (B, model_select[1])
    assert jnp.allclose(out, ref, atol=3e-2, rtol=3e-2), (
        float(jnp.max(jnp.abs(out - ref))))

    print("KERNEL_OK")
</pallas_src>

<mosaic_0001>
module attributes {stable_mosaic.version = 11 : i64} {
  func.func @dense_fc_kernel(%arg0: i32, %arg1: memref<8x32xf32, #tpu.memory_space<vmem>>, %arg2: memref<32x256xbf16, #tpu.memory_space<vmem>>, %arg3: memref<1x256xf32, #tpu.memory_space<vmem>>, %arg4: memref<256x100xbf16, #tpu.memory_space<vmem>>, %arg5: memref<1x100xf32, #tpu.memory_space<vmem>>, %arg6: memref<8x100xf32, #tpu.memory_space<vmem>>) attributes {dimension_semantics = [#tpu.dimension_semantics<parallel>], iteration_bounds = array<i64: 1>, scalar_prefetch = 0 : i64, scratch_operands = 0 : i64, tpu.core_type = #tpu.core_type<tc>, window_params = [{transform_indices = @transform_0, window_bounds = array<i64: 8, 32>}, {pipeline_mode = #tpu.pipeline_mode<synchronous>, transform_indices = @transform_1, window_bounds = array<i64: 32, 256>}, {pipeline_mode = #tpu.pipeline_mode<synchronous>, transform_indices = @transform_2, window_bounds = array<i64: 1, 256>}, {pipeline_mode = #tpu.pipeline_mode<synchronous>, transform_indices = @transform_3, window_bounds = array<i64: 256, 100>}, {pipeline_mode = #tpu.pipeline_mode<synchronous>, transform_indices = @transform_4, window_bounds = array<i64: 1, 100>}, {transform_indices = @transform_5, window_bounds = array<i64: 8, 100>}]} {
    %c0 = arith.constant 0 : index
    %c0_0 = arith.constant 0 : index
    %0 = vector.load %arg1[%c0, %c0_0] : memref<8x32xf32, #tpu.memory_space<vmem>>, vector<8x32xf32>
    %1 = arith.truncf %0 : vector<8x32xf32> to vector<8x32xbf16>
    %c0_1 = arith.constant 0 : index
    %c0_2 = arith.constant 0 : index
    %2 = vector.load %arg2[%c0_1, %c0_2] : memref<32x256xbf16, #tpu.memory_space<vmem>>, vector<32x256xbf16>
    %cst = arith.constant dense<0.000000e+00> : vector<8x256xf32>
    %3 = tpu.matmul %1, %2, %cst {dimension_numbers = #tpu.dot_dimension_numbers<[1], [0], [0], [1], [0, 0, 1, 1], [], []>} : vector<8x32xbf16>, vector<32x256xbf16>, vector<8x256xf32> -> vector<8x256xf32>
    %c0_3 = arith.constant 0 : index
    %c0_4 = arith.constant 0 : index
    %4 = vector.load %arg3[%c0_3, %c0_4] : memref<1x256xf32, #tpu.memory_space<vmem>>, vector<1x256xf32>
    %5 = vector.broadcast %4 : vector<1x256xf32> to vector<8x256xf32>
    %6 = arith.addf %3, %5 : vector<8x256xf32>
    %7 = arith.truncf %6 : vector<8x256xf32> to vector<8x256xbf16>
    %8 = math.tanh %7 : vector<8x256xbf16>
    %c0_5 = arith.constant 0 : index
    %c0_6 = arith.constant 0 : index
    %9 = vector.load %arg4[%c0_5, %c0_6] : memref<256x100xbf16, #tpu.memory_space<vmem>>, vector<256x100xbf16>
    %cst_7 = arith.constant dense<0.000000e+00> : vector<8x100xf32>
    %10 = tpu.matmul %8, %9, %cst_7 {dimension_numbers = #tpu.dot_dimension_numbers<[1], [0], [0], [1], [0, 0, 1, 1], [], []>} : vector<8x256xbf16>, vector<256x100xbf16>, vector<8x100xf32> -> vector<8x100xf32>
    %c0_8 = arith.constant 0 : index
    %c0_9 = arith.constant 0 : index
    %11 = vector.load %arg5[%c0_8, %c0_9] : memref<1x100xf32, #tpu.memory_space<vmem>>, vector<1x100xf32>
    %12 = vector.broadcast %11 : vector<1x100xf32> to vector<8x100xf32>
    %13 = arith.addf %10, %12 : vector<8x100xf32>
    %14 = math.tanh %13 : vector<8x100xf32>
    %c0_10 = arith.constant 0 : index
    %c0_11 = arith.constant 0 : index
    %15 = vector.load %arg6[%c0_10, %c0_11] : memref<8x100xf32, #tpu.memory_space<vmem>>, vector<8x100xf32>
    tpu.vector_store %arg6[%c0_10, %c0_11], %14 {strides = array<i32>} : memref<8x100xf32, #tpu.memory_space<vmem>>, vector<8x100xf32>,
    return
  }
  func.func @transform_0(%arg0: i32) -> (i32, i32) {
    %c0_i32 = arith.constant 0 : i32
    %c0_i32_0 = arith.constant 0 : i32
    return %arg0, %c0_i32 : i32, i32
  }
  func.func @transform_1(%arg0: i32) -> (i32, i32) {
    %c0_i32 = arith.constant 0 : i32
    %c0_i32_0 = arith.constant 0 : i32
    %c0_i32_1 = arith.constant 0 : i32
    return %c0_i32, %c0_i32_0 : i32, i32
  }
  func.func @transform_2(%arg0: i32) -> (i32, i32) {
    %c0_i32 = arith.constant 0 : i32
    %c0_i32_0 = arith.constant 0 : i32
    %c0_i32_1 = arith.constant 0 : i32
    return %c0_i32, %c0_i32_0 : i32, i32
  }
  func.func @transform_3(%arg0: i32) -> (i32, i32) {
    %c0_i32 = arith.constant 0 : i32
    %c0_i32_0 = arith.constant 0 : i32
    %c0_i32_1 = arith.constant 0 : i32
    return %c0_i32, %c0_i32_0 : i32, i32
  }
  func.func @transform_4(%arg0: i32) -> (i32, i32) {
    %c0_i32 = arith.constant 0 : i32
    %c0_i32_0 = arith.constant 0 : i32
    %c0_i32_1 = arith.constant 0 : i32
    return %c0_i32, %c0_i32_0 : i32, i32
  }
  func.func @transform_5(%arg0: i32) -> (i32, i32) {
    %c0_i32 = arith.constant 0 : i32
    %c0_i32_0 = arith.constant 0 : i32
    return %arg0, %c0_i32 : i32, i32
  }
}

</mosaic_0001>

<bundles_post_ra>
// kernel: dense_fc.1
= control target key start
LH: loop header
LB: loop body
LE: loop exit
PB: predicated region body
PF: predicated region fallthrough
CT: control target
= control target key end

     0   :  { %v399_v2 = vmov 0   ;;  %vm60_vm0 = vcmask 261120   ;;  %s512_s0 = inlined_call_operand.vmem [shape: f32[8,32], index: 0, kind: input, shape index: {}]   ;;  %s513_s1 = inlined_call_operand.vmem [shape: bf16[32,256], index: 1, kind: input, shape index: {}]   ;;  %s514_s2 = inlined_call_operand.vmem [shape: f32[1,256], index: 2, kind: input, shape index: {}]   ;;  %s515_s3 = inlined_call_operand.vmem [shape: bf16[256,100], index: 3, kind: input, shape index: {}]   ;;  %s516_s4 = inlined_call_operand.vmem [shape: f32[1,100], index: 4, kind: input, shape index: {}]   ;;  %s517_s5 = inlined_call_operand.hbm [shape: f32[8,100], index: 5, kind: output, shape index: {}]  }
   0x1   :  { %v347_v0 = vld [vmem:[%s513_s1 + $0x4] ss:$8 sps:$4 sm:$0xff]   ;;  %v349_v1 = vld [vmem:[%s513_s1] ss:$8 sps:$4 sm:$0xff]   ;;  %96 = vmatprep.mubr.bf16.mxu0 %v399_v2  ;;  %v350_v3 = vld [vmem:[%s513_s1 + $0x14] ss:$8 sps:$4 sm:$0xff]  }
   0x2   :  { %64 = vmatprep.subr.bf16.mxu0 %v347_v0  ;;  %v352_v4 = vld [vmem:[%s513_s1 + $0x10] ss:$8 sps:$4 sm:$0xff]   ;;  %v22_v5 = vld [vmem:[%s512_s0] sm:$0xff]  ;;  %v355_v8 = vld [vmem:[%s515_s3 + $0x48] sm:$0xff]  }
   0x3   :  { %65 = vmatpush1.bf16.msra.mxu0 %v349_v1  ;;  %v353_v6 = vld [vmem:[%s515_s3 + $0x40] sm:$0xff]   ;;  %v23_v9 = vpack.c.bf16 %v22_v5, %v22_v5  ;;  %v356_v10 = vld [vmem:[%s515_s3 + $0x8] sm:$0xff]   ;;  %v357_v11 = vld [vmem:[%s515_s3 + $0x50] sm:$0xff]  }
   0x4   :  { %66 = vmatprep.subr.bf16.mxu0 %v350_v3  ;;  %v354_v7 = vld [vmem:[%s515_s3] sm:$0xff]   ;;  %323 = vmatprep.subr.bf16.mxu1 %v353_v6  ;;  %v358_v12 = vld [vmem:[%s515_s3 + $0x10] sm:$0xff]   ;;  %v359_v13 = vld [vmem:[%s515_s3 + $0x58] sm:$0xff]  }
   0x5   :  { %324 = vmatpush3.bf16.msra.mxu1 %v354_v7 }
   0x6   :  { %325 = vmatprep.subr.bf16.mxu1 %v355_v8 }
   0x7   :  { %67 = vmatpush1.bf16.msra.mxu0 %v352_v4 }
   0x9   :  { %326 = vmatpush3.bf16.msra.mxu1 %v356_v10 }
   0xa   :  { %305 = vmatmul.mubr.msk.bf16.vlgmr.msra.gmra.mrb[0].mxu0 %vm60_vm0, %v23_v9  ;;  %327 = vmatprep.subr.bf16.mxu1 %v357_v11 }
   0xd   :  { %328 = vmatpush3.bf16.msra.mxu1 %v358_v12 }
   0xe   :  { %329 = vmatprep.subr.bf16.mxu1 %v359_v13 }
   0xf   :  { %10 = vsyncpa [#allocation3], 0  ;;  %v360_v14 = vld [vmem:[%s515_s3 + $0x18] sm:$0xff]   ;;  %v361_v15 = vld [vmem:[%s515_s3 + $0x60] sm:$0xff]   ;;  %v30_v23 = vlaneseq  ;;  %s400_s9 = smov [#allocation2]   ;;  %vm285_vm1 = vcmask 818176  }
  0x10   :  { %v362_v16 = vld [vmem:[%s515_s3 + $0x20] sm:$0xff]   ;;  %v363_v17 = vld [vmem:[%s515_s3 + $0x68] sm:$0xff]   ;;  %v365_v19 = vld [vmem:[%s515_s3 + $0x70] sm:$0xff]   ;;  %s293_s0 = sshll.u32 %s400_s9, 4  ;;  %s294_s0 = int_to_ptr.vmem [resolvable:$true] %s293_s0 }
  0x11   :  { %330 = vmatpush3.bf16.msra.mxu1 %v360_v14  ;;  %v364_v18 = vld [vmem:[%s515_s3 + $0x28] sm:$0xff]   ;;  %v366_v20 = vld [vmem:[%s515_s3 + $0x30] sm:$0xff]   ;;  %v367_v21 = vld [vmem:[%s515_s3 + $0x78] sm:$0xff]   ;;  %v31_v24 = vshrl.u32 %v30_v23, 7  ;;  %s375_s10 = scalar_lea.vmem %s294_s0, 128  ;;  %p380_p1 = scmp.lt.s32.totalorder %s294_s0, %s294_s0 }
  0x12   :  { %331 = vmatprep.subr.bf16.mxu1 %v361_v15  ;;  %v368_v22 = vld [vmem:[%s515_s3 + $0x38] sm:$0xff]   ;;  %v28_v26 = vld [vmem:[%s514_s2] sm:$0x3]  ;;  %p376_p0 = scmp.ne.s32.totalorder %s294_s0, %s375_s10  ;;  %p381_p2 = scmp.lt.s32.totalorder %s375_s10, %s375_s10 }
  0x13   :  { %v32_v25 = vsub.s32 0, %v31_v24  ;;  %v36_v27 = vsub.s32 1, %v31_v24  ;;  %v306_v41 = vld [vmem:[%s516_s4] ss:$0 sm:$0xff] }
  0x14   :  { %p382_p3 = por %p381_p2, %p380_p1 }
  0x15   :  { %332 = vmatpush3.bf16.msra.mxu1 %v362_v16  ;;  %v33_v28 = vrot.slane %v28_v26, %v32_v25  ;;  %v37_v29 = vrot.slane %v28_v26, %v36_v27 }
  0x16   :  { %333 = vmatprep.subr.bf16.mxu1 %v363_v17  ;;  %p383_p4 = pnand %p382_p3, %p376_p0 }
  0x19   :  { %334 = vmatpush3.bf16.msra.mxu1 %v364_v18 }
  0x1a   :  { %335 = vmatprep.subr.bf16.mxu1 %v365_v19 }
  0x1d   :  { %336 = vmatpush3.bf16.msra.mxu1 %v366_v20 }
  0x1e   :  { %337 = vmatprep.subr.bf16.mxu1 %v367_v21 }
  0x21   :  { %338 = vmatpush3.bf16.msra.mxu1 %v368_v22 }
  0xdd   :  { %v98_v30 = vpop.f32.mrb[0].mxu0 }
  0xde   :  { %v99_v31 = vadd.f32 %v98_v30, %v33_v28  ;;  %v100_v32 = vpop.f32.mrb[1].mxu0 }
  0xdf   :  { %v101_v33 = vadd.f32 %v100_v32, %v37_v29  ;;  %v102_v34 = vpop.f32.mrb[2].mxu0 }
  0xe0   :  { %v105_v35 = vpack.c.bf16 %v99_v31, %v99_v31  ;;  %v103_v36 = vpop.f32.mrb[3].mxu0 }
  0xe1   :  { %v106_v37 = vpack.c.bf16 %v101_v33, %v101_v33 }
  0xe3   :  { %369 = vtanh.bf16 %v106_v37 }
  0xe4   :  { %371 = vtanh.bf16 %v105_v35 }
  0xee   :  { %v370_v38 = vpop.eup %369 }
  0xef   :  { %v372_v39 = vpop.eup %371  ;;  %276 = vmatprep.mubr.bf16.mxu1 %v370_v38 }
  0xf0   :  { %277 = vmatmul.mubr.bf16.vlgmr.msra.gmra.mrb[0].mxu1 %v372_v39 }
 0x1c3   :  { %v339_v40 = vpop.f32.mrb[0].mxu1 }
 0x1c4   :  { %v340_v42 = vpop.f32.mrb[1].mxu1 }
 0x1c5   :  { %v341_v43 = vadd.f32 %v340_v42, %v339_v40  ;;  %v342_v44 = vpop.f32.mrb[2].mxu1 }
 0x1c6   :  { %v343_v45 = vpop.f32.mrb[3].mxu1 }
 0x1c7   :  { %v279_v46 = vadd.f32 %v341_v43, %v306_v41 }
 0x1c9   :  { %373 = vtanh.f32 %v279_v46 }
 0x1d3   :  { %v374_v47 = vpop.eup %373 }
 0x1d4   :  { %286 = vst.msk [vmem:[#allocation2] sm:$0xff] %vm285_vm1, %v374_v47 }
 0x1d5   :  { %386 = shalt.err (!%p383_p4)
}
 0x1d6   :  { %s387_s12 = scalar_lea.hbm %s517_s5, 128 }
 0x1d7   :  { %p388_p5 = scmp.ne.s32.totalorder %s517_s5, %s387_s12  ;;  %p391_p6 = scmp.lt.u32.totalorder %s387_s12, %s517_s5 }
 0x1d9   :  { %p393_p7 = pnand %p391_p6, %p388_p5 }
 0x1db   :  { %396 = shalt.err (!%p393_p7)
}
 0x1dc   :  { %296 = dma.vmem_to_hbm [thread:$0]  %s294_s0, 128, %s517_s5, [#allocation3]  }
 0x1dd   :  { %397 = dma.done.wait [#allocation3], 128  }
 0x1de   :  { %398 = vsyncadd [#allocation3], 4294967168 }
 0x1df   :  { %300 = vsyncpa [#allocation3], 1 }

</bundles_post_ra>
